<compile_context>
chip_gen: v5e
topology: v5e:2x2
jax: 0.10.0
libtpu: 0.0.40
codegen_flags: <defaults>
</compile_context>

<pallas_src>
import functools

import jax
import jax.numpy as jnp
from jax.experimental import pallas as pl
from jax.experimental.pallas import tpu as pltpu


def _round_up(x, m):
    return -(-x // m) * m


def _choose_tiles(flat_valid, wp, c_in, c_out, in_itemsize,
                  target_lanes=8192, vmem_budget=24 * 1024 * 1024,
                  vreg_budget_elems=48 * 1024):
    """Pick (s_tile, s_halo, n_tiles, chunk, n_chunks).

    s_tile : lanes of output produced per grid step (multiple of chunk).
    s_halo : extra input lanes fetched past the tile (>= 2*Wp + 2, 128-mult).
    chunk  : in-kernel strip-mine width (multiple of 128), sized so live
             per-chunk vector state stays well inside the 64-vreg file.
    """
    s_halo = _round_up(2 * wp + 2, 128)

    # ~ (win + sq + agg + center + val)*C + out*O elements live per chunk.
    chunk = (vreg_budget_elems // (4 * c_in + c_out)) // 128 * 128
    chunk = max(128, min(512, chunk))

    small = _round_up(flat_valid, 128)
    if small <= chunk:
        s_tile = small
        chunk = small
    else:
        s_tile = min(_round_up(flat_valid, chunk), _round_up(target_lanes, chunk))

        def footprint(s):
            # 2x double-buffered input slab + 2x double-buffered f32 out block.
            return 2 * c_in * (s + s_halo) * in_itemsize + 2 * c_out * s * 4

        while s_tile > chunk and footprint(s_tile) > vmem_budget:
            s_tile = _round_up(s_tile // 2, chunk)

    n_tiles = -(-flat_valid // s_tile)
    n_chunks = s_tile // chunk

    assert s_tile % 128 == 0 and s_tile % chunk == 0
    assert s_halo >= 2 * wp + 2, "halo must cover the 3x3 window reach"
    return s_tile, s_halo, n_tiles, chunk, n_chunks


def _make_kernel(wp, s_tile, s_halo, chunk, n_chunks, c_in, c_out,
                 use_mxu, matmul_bf16):
    win_len = chunk + s_halo

    def kernel(sgn_ref, thr_ref, per_ref, core_ref, x_hbm, out_ref, slab, sem):
        b = pl.program_id(0)
        r = pl.program_id(1)
        n_r = pl.num_programs(1)
        slot = r % 2

        def tile_copy(row_tile, slot_idx):
            return pltpu.make_async_copy(
                x_hbm.at[b, :, pl.ds(row_tile * s_tile, s_tile + s_halo)],
                slab.at[slot_idx],
                sem.at[slot_idx],
            )

        # Prime the pipeline at the first row-tile of every image.  The tile
        # axis is "arbitrary" (sequential per core), so this is safe even when
        # the batch axis is split across v7x's two TensorCores.
        @pl.when(r == 0)
        def _():
            tile_copy(0, 0).start()

        # Scalars / tiny weights: read before the DMA wait.
        sgn = sgn_ref[0]                       # sign(scale)
        thr_s = thr_ref[0]                     # threshold * sign(scale)
        per = [per_ref[t] for t in range(8)]   # periphery taps
        cw = core_ref[...]                     # (O, C) f32
        if not use_mxu:
            core_cols = [cw[:, c:c + 1] for c in range(c_in)]   # (O, 1) each

        # Wait for this tile's input window, then prefetch the next one.
        tile_copy(r, slot).wait()

        @pl.when(r + 1 < n_r)
        def _():
            tile_copy(r + 1, 1 - slot).start()

        cur = slab.at[slot]                    # (C, s_tile + s_halo)

        def chunk_body(j, carry):
            base = pl.multiple_of(j * chunk, 128)
            # One aligned window load per chunk; all 9 taps are value slices
            # of it (register realignment instead of 9 misaligned vlds).
            win = cur[:, pl.ds(base, win_len)].astype(jnp.float32)  # (C, W)
            center = win[:, wp + 1: wp + 1 + chunk]                 # (C, chunk)

            sq = jnp.zeros_like(center)
            agg = jnp.zeros_like(center)
            t = 0
            for dh in range(3):                # fused pass: variance + agg
                for dw in range(3):
                    if dh == 1 and dw == 1:
                        continue
                    off = dh * wp + dw
                    tap = win[:, off: off + chunk]
                    d = tap - center
                    sq = sq + d * d
                    agg = agg + tap * per[t]
                    t += 1

            div = jnp.sum(sq, axis=0, keepdims=True)                # (1, chunk)
            # sigmoid((div-thr)*scale) > 0.5  <=>  div*sign(scale) > thr*sign.
            m_hard = div * sgn > thr_s
            val = jnp.where(m_hard, agg, center)                    # (C, chunk)

            if use_mxu:
                lhs = cw.astype(jnp.bfloat16) if matmul_bf16 else cw
                rhs = val.astype(jnp.bfloat16) if matmul_bf16 else val
                o_chunk = jnp.dot(lhs, rhs, preferred_element_type=jnp.float32)
            else:
                # Tiny-C 1x1 projection on the VPU (avoids near-empty MXU
                # passes and the core-operand relayout).
                o_chunk = core_cols[0] * val[0:1, :]
                for c in range(1, c_in):
                    o_chunk = o_chunk + core_cols[c] * val[c:c + 1, :]

            out_ref[0, :, pl.ds(base, chunk)] = o_chunk
            return carry

        jax.lax.fori_loop(0, n_chunks, chunk_body, 0)

    return kernel


@functools.partial(
    jax.jit,
    static_argnames=("stride", "padding", "input_dtype", "target_lanes",
                     "matmul_bf16"))
def spconv2d(x, core, threshold, scale, periphery, *, stride=1, padding=0,
             input_dtype=jnp.float32, target_lanes=8192, matmul_bf16=True):
    B, C, H, W = x.shape
    O = core.shape[0]

    Hp, Wp = H + 2 * padding, W + 2 * padding
    h_full, w_full = Hp - 2, Wp - 2              # stride-1 dense output extent
    assert h_full > 0 and w_full > 0, "input too small for a 3x3 window"
    flat_valid = h_full * Wp

    itemsize = jnp.finfo(input_dtype).bits // 8
    s_tile, s_halo, n_tiles, chunk, n_chunks = _choose_tiles(
        flat_valid, Wp, C, O, itemsize, target_lanes=target_lanes)
    flat_len = n_tiles * s_tile + s_halo         # padded flat length (>= Hp*Wp+2)

    # (B, C, Hp, Wp) -> (B, C, flat) with zero tail padding; no im2col in HBM.
    xp = jnp.pad(x.astype(input_dtype),
                 ((0, 0), (0, 0), (padding, padding), (padding, padding)))
    xflat = xp.reshape(B, C, Hp * Wp)
    xflat = jnp.pad(xflat, ((0, 0), (0, 0), (0, flat_len - Hp * Wp)))

    core_mat = core.reshape(O, C).astype(jnp.float32)
    sgn = jnp.sign(scale.astype(jnp.float32)).reshape(1)
    thr_sgn = (threshold.astype(jnp.float32) * sgn).reshape(1)
    use_mxu = C > 32

    out_flat = pl.pallas_call(
        _make_kernel(Wp, s_tile, s_halo, chunk, n_chunks, C, O,
                     use_mxu, matmul_bf16),
        out_shape=jax.ShapeDtypeStruct((B, O, n_tiles * s_tile), jnp.float32),
        grid=(B, n_tiles),
        in_specs=[
            pl.BlockSpec(memory_space=pltpu.MemorySpace.SMEM),   # sign(scale)     (1,)
            pl.BlockSpec(memory_space=pltpu.MemorySpace.SMEM),   # thr*sign(scale) (1,)
            pl.BlockSpec(memory_space=pltpu.MemorySpace.SMEM),   # periphery       (8,)
            pl.BlockSpec((O, C), lambda b, r: (0, 0)),           # core            (O, C)
            pl.BlockSpec(memory_space=pl.ANY),                   # xflat (B, C, F) in HBM
        ],
        out_specs=pl.BlockSpec((1, O, s_tile), lambda b, r: (b, 0, r)),
        scratch_shapes=[
            pltpu.VMEM((2, C, s_tile + s_halo), input_dtype),    # input double buffer
            pltpu.SemaphoreType.DMA((2,)),
        ],
        compiler_params=pltpu.CompilerParams(
            dimension_semantics=("parallel", "arbitrary"),
            vmem_limit_bytes=48 * 1024 * 1024,
        ),
    )(sgn, thr_sgn, periphery.astype(jnp.float32), core_mat, xflat)

    # Metadata-only reshape + crop (no transpose); stride handled by subsample.
    out = out_flat[:, :, :flat_valid].reshape(B, O, h_full, Wp)
    return out[:, :, ::stride, 0:w_full:stride]


# ----------------------------- reference ------------------------------------


def _extract_patches(x, stride, padding):
    """NCHW -> (B, C, 9, H_out, W_out), row-major kernel positions (F.unfold)."""
    B, C, H, W = x.shape
    K = 3
    H_out = (H + 2 * padding - K) // stride + 1
    W_out = (W + 2 * padding - K) // stride + 1
    xp = jnp.pad(x, ((0, 0), (0, 0), (padding, padding), (padding, padding)))
    slices = []
    for di in range(K):
        for dj in range(K):
            s = jax.lax.slice(
                xp,
                (0, 0, di, dj),
                (B, C, di + (H_out - 1) * stride + 1, dj + (W_out - 1) * stride + 1),
                (1, 1, stride, stride),
            )
            slices.append(s)
    return jnp.stack(slices, axis=2), H_out, W_out


def spconv2d_ref(x, core, threshold, scale, periphery, *, stride=1, padding=0):
    """Pure-JAX reference mirroring the PyTorch forward."""
    B, C, H, W = x.shape
    O = core.shape[0]
    patches, H_out, W_out = _extract_patches(x, stride, padding)
    L = H_out * W_out
    patches = patches.reshape(B, C, 9, L).astype(jnp.float32)
    center = patches[:, :, 4, :]
    diffs = (patches - center[:, :, None, :]) ** 2
    div = diffs.sum(axis=(1, 2))
    m_soft = jax.nn.sigmoid((div - threshold[0]) * scale[0])
    m_hard = m_soft > 0.5
    w = core.reshape(O, C).astype(jnp.float32)
    peri = patches[:, :, jnp.array([0, 1, 2, 3, 5, 6, 7, 8]), :]
    agg = (peri * periphery[None, None, :, None]).sum(axis=2)
    val = jnp.where(m_hard[:, None, :], agg, center)
    out = jnp.einsum("bcl,oc->bol", val, w)
    return out.reshape(B, O, H_out, W_out)


if __name__ == "__main__":
    key = jax.random.PRNGKey(0)
    kx, kc, kp = jax.random.split(key, 3)

    B, C_in, C_out, H, W = 2, 4, 8, 16, 16
    stride, padding = 1, 0

    x = jax.random.normal(kx, (B, C_in, H, W), dtype=jnp.float32)

    # Deterministic parameter init (shapes per SPConv2d.__init__).
    fan_in = C_in  # core is a 1x1 kernel
    bound = jnp.sqrt(2.0) * jnp.sqrt(3.0 / fan_in)  # kaiming_uniform, a=0
    core = jax.random.uniform(kc, (C_out, C_in, 1, 1), jnp.float32, -bound, bound)
    periphery = jax.random.uniform(kp, (8,), jnp.float32, -0.1, 0.1)
    threshold = jnp.array([0.1], dtype=jnp.float32)
    scale = jnp.array([10.0], dtype=jnp.float32)

    out = spconv2d(x, core, threshold, scale, periphery,
                   stride=stride, padding=padding)
    out = jax.block_until_ready(out)

    ref = spconv2d_ref(x, core, threshold, scale, periphery,
                       stride=stride, padding=padding)
    assert out.shape == ref.shape == (B, C_out, H - 2, W - 2)
    assert jnp.allclose(out, ref, rtol=1e-5, atol=1e-5), \
        f"max abs err = {jnp.max(jnp.abs(out - ref))}"

    print("KERNEL_OK")
</pallas_src>

<mosaic_0001>
module attributes {stable_mosaic.version = 11 : i64} {
  func.func @kernel(%arg0: i32, %arg1: i32, %arg2: memref<1xf32, #tpu.memory_space<smem>>, %arg3: memref<1xf32, #tpu.memory_space<smem>>, %arg4: memref<8xf32, #tpu.memory_space<smem>>, %arg5: memref<8x4xf32, #tpu.memory_space<vmem>>, %arg6: memref<2x4x384xf32, #tpu.memory_space<any>>, %arg7: memref<1x8x256xf32, #tpu.memory_space<vmem>>, %arg8: memref<2x4x384xf32, #tpu.memory_space<vmem>>, %arg9: memref<2x!tpu.dma_semaphore, #tpu.memory_space<semaphore_mem>>) attributes {dimension_semantics = [#tpu.dimension_semantics<parallel>, #tpu.dimension_semantics<arbitrary>], iteration_bounds = array<i64: 2, 1>, scalar_prefetch = 0 : i64, scratch_operands = 2 : i64, tpu.core_type = #tpu.core_type<tc>, window_params = [{transform_indices = @transform_0, window_bounds = array<i64: 1>}, {transform_indices = @transform_1, window_bounds = array<i64: 1>}, {transform_indices = @transform_2, window_bounds = array<i64: 8>}, {pipeline_mode = #tpu.pipeline_mode<synchronous>, transform_indices = @transform_3, window_bounds = array<i64: 8, 4>}, {}, {transform_indices = @transform_5, window_bounds = array<i64: 1, 8, 256>}]} {
    %c2_i32 = arith.constant 2 : i32
    %c0_i32 = arith.constant 0 : i32
    %0 = arith.cmpi eq, %c2_i32, %c0_i32 : i32
    %c1_i32 = arith.constant 1 : i32
    %1 = arith.select %0, %c1_i32, %c2_i32 : i32
    %2 = arith.remsi %arg1, %1 : i32
    %c0_i32_0 = arith.constant 0 : i32
    %3 = arith.cmpi ne, %2, %c0_i32_0 : i32
    %c0_i32_1 = arith.constant 0 : i32
    %4 = arith.cmpi slt, %2, %c0_i32_1 : i32
    %c0_i32_2 = arith.constant 0 : i32
    %5 = arith.cmpi slt, %1, %c0_i32_2 : i32
    %6 = arith.xori %4, %5 : i1
    %7 = arith.andi %6, %3 : i1
    %8 = arith.addi %2, %1 : i32
    %9 = arith.select %7, %8, %2 : i32
    %c0_i32_3 = arith.constant 0 : i32
    %10 = arith.cmpi eq, %arg1, %c0_i32_3 : i32
    %11 = arith.extui %10 : i1 to i32
    %c0_i32_4 = arith.constant 0 : i32
    %12 = arith.cmpi ne, %11, %c0_i32_4 : i32
    scf.if %12 {
      %c0_i32_25 = arith.constant 0 : i32
      %c0_i32_26 = arith.constant 0 : i32
      %c0_i32_27 = arith.constant 0 : i32
      %c0_i32_28 = arith.constant 0 : i32
      %136 = tpu.memref_slice %arg6[%arg0, %c0_i32_27, %c0_i32_28] : memref<2x4x384xf32, #tpu.memory_space<any>> -> memref<1x4x384xf32, #tpu.memory_space<any>>
      %137 = tpu.memref_squeeze %136 : memref<1x4x384xf32, #tpu.memory_space<any>> -> memref<4x384xf32, #tpu.memory_space<any>>
      %c0_i32_29 = arith.constant 0 : i32
      %c0_i32_30 = arith.constant 0 : i32
      %138 = tpu.memref_slice %arg8[%c0_i32_25, %c0_i32_29, %c0_i32_30] : memref<2x4x384xf32, #tpu.memory_space<vmem>> -> memref<1x4x384xf32, #tpu.memory_space<vmem>>
      %139 = tpu.memref_squeeze %138 : memref<1x4x384xf32, #tpu.memory_space<vmem>> -> memref<4x384xf32, #tpu.memory_space<vmem>>
      %140 = tpu.memref_slice %arg9[%c0_i32_26] : memref<2x!tpu.dma_semaphore, #tpu.memory_space<semaphore_mem>> -> memref<1x!tpu.dma_semaphore, #tpu.memory_space<semaphore_mem>>
      %141 = tpu.memref_squeeze %140 : memref<1x!tpu.dma_semaphore, #tpu.memory_space<semaphore_mem>> -> memref<!tpu.dma_semaphore, #tpu.memory_space<semaphore_mem>>
      tpu.enqueue_dma source(%137 : memref<4x384xf32, #tpu.memory_space<any>>) target(%139 : memref<4x384xf32, #tpu.memory_space<vmem>>) target_semaphore(%141 : memref<!tpu.dma_semaphore, #tpu.memory_space<semaphore_mem>>)
    } else {
    }
    %c0 = arith.constant 0 : index
    %13 = memref.load %arg2[%c0] : memref<1xf32, #tpu.memory_space<smem>>
    %c0_5 = arith.constant 0 : index
    %14 = memref.load %arg3[%c0_5] : memref<1xf32, #tpu.memory_space<smem>>
    %c0_6 = arith.constant 0 : index
    %15 = memref.load %arg4[%c0_6] : memref<8xf32, #tpu.memory_space<smem>>
    %c1 = arith.constant 1 : index
    %16 = memref.load %arg4[%c1] : memref<8xf32, #tpu.memory_space<smem>>
    %c2 = arith.constant 2 : index
    %17 = memref.load %arg4[%c2] : memref<8xf32, #tpu.memory_space<smem>>
    %c3 = arith.constant 3 : index
    %18 = memref.load %arg4[%c3] : memref<8xf32, #tpu.memory_space<smem>>
    %c4 = arith.constant 4 : index
    %19 = memref.load %arg4[%c4] : memref<8xf32, #tpu.memory_space<smem>>
    %c5 = arith.constant 5 : index
    %20 = memref.load %arg4[%c5] : memref<8xf32, #tpu.memory_space<smem>>
    %c6 = arith.constant 6 : index
    %21 = memref.load %arg4[%c6] : memref<8xf32, #tpu.memory_space<smem>>
    %c7 = arith.constant 7 : index
    %22 = memref.load %arg4[%c7] : memref<8xf32, #tpu.memory_space<smem>>
    %c0_7 = arith.constant 0 : index
    %c0_8 = arith.constant 0 : index
    %23 = vector.load %arg5[%c0_7, %c0_8] : memref<8x4xf32, #tpu.memory_space<vmem>>, vector<8x4xf32>
    %24 = vector.extract_strided_slice %23 {offsets = [0, 0], sizes = [8, 1], strides = [1, 1]} : vector<8x4xf32> to vector<8x1xf32>
    %25 = vector.extract_strided_slice %23 {offsets = [0, 1], sizes = [8, 1], strides = [1, 1]} : vector<8x4xf32> to vector<8x1xf32>
    %26 = vector.extract_strided_slice %23 {offsets = [0, 2], sizes = [8, 1], strides = [1, 1]} : vector<8x4xf32> to vector<8x1xf32>
    %27 = vector.extract_strided_slice %23 {offsets = [0, 3], sizes = [8, 1], strides = [1, 1]} : vector<8x4xf32> to vector<8x1xf32>
    %c256_i32 = arith.constant 256 : i32
    %28 = arith.muli %arg1, %c256_i32 : i32
    %c0_i32_9 = arith.constant 0 : i32
    %29 = tpu.memref_slice %arg6[%arg0, %c0_i32_9, %28] : memref<2x4x384xf32, #tpu.memory_space<any>> -> memref<1x4x384xf32, #tpu.memory_space<any>>
    %30 = tpu.memref_squeeze %29 : memref<1x4x384xf32, #tpu.memory_space<any>> -> memref<4x384xf32, #tpu.memory_space<any>>
    %c0_i32_10 = arith.constant 0 : i32
    %c0_i32_11 = arith.constant 0 : i32
    %31 = tpu.memref_slice %arg8[%9, %c0_i32_10, %c0_i32_11] : memref<2x4x384xf32, #tpu.memory_space<vmem>> -> memref<1x4x384xf32, #tpu.memory_space<vmem>>
    %32 = tpu.memref_squeeze %31 : memref<1x4x384xf32, #tpu.memory_space<vmem>> -> memref<4x384xf32, #tpu.memory_space<vmem>>
    %33 = tpu.memref_slice %arg9[%9] : memref<2x!tpu.dma_semaphore, #tpu.memory_space<semaphore_mem>> -> memref<1x!tpu.dma_semaphore, #tpu.memory_space<semaphore_mem>>
    %34 = tpu.memref_squeeze %33 : memref<1x!tpu.dma_semaphore, #tpu.memory_space<semaphore_mem>> -> memref<!tpu.dma_semaphore, #tpu.memory_space<semaphore_mem>>
    tpu.wait_dma2 semaphore(%34 : memref<!tpu.dma_semaphore, #tpu.memory_space<semaphore_mem>>) src(%30 : memref<4x384xf32, #tpu.memory_space<any>>) dst(%32 : memref<4x384xf32, #tpu.memory_space<vmem>>)
    %c1_i32_12 = arith.constant 1 : i32
    %35 = arith.addi %arg1, %c1_i32_12 : i32
    %c1_i32_13 = arith.constant 1 : i32
    %36 = arith.cmpi slt, %35, %c1_i32_13 : i32
    %37 = arith.extui %36 : i1 to i32
    %c0_i32_14 = arith.constant 0 : i32
    %38 = arith.cmpi ne, %37, %c0_i32_14 : i32
    scf.if %38 {
      %c1_i32_25 = arith.constant 1 : i32
      %136 = arith.addi %arg1, %c1_i32_25 : i32
      %c1_i32_26 = arith.constant 1 : i32
      %137 = arith.subi %c1_i32_26, %9 : i32
      %c256_i32_27 = arith.constant 256 : i32
      %138 = arith.muli %136, %c256_i32_27 : i32
      %c0_i32_28 = arith.constant 0 : i32
      %139 = tpu.memref_slice %arg6[%arg0, %c0_i32_28, %138] : memref<2x4x384xf32, #tpu.memory_space<any>> -> memref<1x4x384xf32, #tpu.memory_space<any>>
      %140 = tpu.memref_squeeze %139 : memref<1x4x384xf32, #tpu.memory_space<any>> -> memref<4x384xf32, #tpu.memory_space<any>>
      %c0_i32_29 = arith.constant 0 : i32
      %c0_i32_30 = arith.constant 0 : i32
      %141 = tpu.memref_slice %arg8[%137, %c0_i32_29, %c0_i32_30] : memref<2x4x384xf32, #tpu.memory_space<vmem>> -> memref<1x4x384xf32, #tpu.memory_space<vmem>>
      %142 = tpu.memref_squeeze %141 : memref<1x4x384xf32, #tpu.memory_space<vmem>> -> memref<4x384xf32, #tpu.memory_space<vmem>>
      %143 = tpu.memref_slice %arg9[%137] : memref<2x!tpu.dma_semaphore, #tpu.memory_space<semaphore_mem>> -> memref<1x!tpu.dma_semaphore, #tpu.memory_space<semaphore_mem>>
      %144 = tpu.memref_squeeze %143 : memref<1x!tpu.dma_semaphore, #tpu.memory_space<semaphore_mem>> -> memref<!tpu.dma_semaphore, #tpu.memory_space<semaphore_mem>>
      tpu.enqueue_dma source(%140 : memref<4x384xf32, #tpu.memory_space<any>>) target(%142 : memref<4x384xf32, #tpu.memory_space<vmem>>) target_semaphore(%144 : memref<!tpu.dma_semaphore, #tpu.memory_space<semaphore_mem>>)
    } else {
    }
    %c0_i32_15 = arith.constant 0 : i32
    %c256_i32_16 = arith.constant 256 : i32
    %39 = arith.muli %c0_i32_15, %c256_i32_16 : i32
    %40 = tpu.assume_multiple %39, 128 : i32
    %c0_i32_17 = arith.constant 0 : i32
    %c0_i32_18 = arith.constant 0 : i32
    %41 = tpu.memref_slice %arg8[%9, %c0_i32_17, %c0_i32_18] : memref<2x4x384xf32, #tpu.memory_space<vmem>> -> memref<1x4x384xf32, #tpu.memory_space<vmem>>
    %42 = tpu.memref_squeeze %41 : memref<1x4x384xf32, #tpu.memory_space<vmem>> -> memref<4x384xf32, #tpu.memory_space<vmem>>
    %c0_19 = arith.constant 0 : index
    %43 = arith.index_cast %40 : i32 to index
    %44 = vector.load %42[%c0_19, %43] : memref<4x384xf32, #tpu.memory_space<vmem>>, vector<4x384xf32>
    %45 = vector.extract_strided_slice %44 {offsets = [0, 17], sizes = [4, 256], strides = [1, 1]} : vector<4x384xf32> to vector<4x256xf32>
    %cst = arith.constant 0.000000e+00 : f32
    %46 = vector.broadcast %cst : f32 to vector<4x256xf32>
    %cst_20 = arith.constant 0.000000e+00 : f32
    %47 = vector.broadcast %cst_20 : f32 to vector<4x256xf32>
    %48 = vector.extract_strided_slice %44 {offsets = [0, 0], sizes = [4, 256], strides = [1, 1]} : vector<4x384xf32> to vector<4x256xf32>
    %49 = arith.subf %48, %45 : vector<4x256xf32>
    %50 = arith.mulf %49, %49 : vector<4x256xf32>
    %51 = arith.addf %46, %50 : vector<4x256xf32>
    %52 = vector.broadcast %15 : f32 to vector<4x256xf32>
    %53 = arith.mulf %48, %52 : vector<4x256xf32>
    %54 = arith.addf %47, %53 : vector<4x256xf32>
    %55 = vector.extract_strided_slice %44 {offsets = [0, 1], sizes = [4, 256], strides = [1, 1]} : vector<4x384xf32> to vector<4x256xf32>
    %56 = arith.subf %55, %45 : vector<4x256xf32>
    %57 = arith.mulf %56, %56 : vector<4x256xf32>
    %58 = arith.addf %51, %57 : vector<4x256xf32>
    %59 = vector.broadcast %16 : f32 to vector<4x256xf32>
    %60 = arith.mulf %55, %59 : vector<4x256xf32>
    %61 = arith.addf %54, %60 : vector<4x256xf32>
    %62 = vector.extract_strided_slice %44 {offsets = [0, 2], sizes = [4, 256], strides = [1, 1]} : vector<4x384xf32> to vector<4x256xf32>
    %63 = arith.subf %62, %45 : vector<4x256xf32>
    %64 = arith.mulf %63, %63 : vector<4x256xf32>
    %65 = arith.addf %58, %64 : vector<4x256xf32>
    %66 = vector.broadcast %17 : f32 to vector<4x256xf32>
    %67 = arith.mulf %62, %66 : vector<4x256xf32>
    %68 = arith.addf %61, %67 : vector<4x256xf32>
    %69 = vector.extract_strided_slice %44 {offsets = [0, 16], sizes = [4, 256], strides = [1, 1]} : vector<4x384xf32> to vector<4x256xf32>
    %70 = arith.subf %69, %45 : vector<4x256xf32>
    %71 = arith.mulf %70, %70 : vector<4x256xf32>
    %72 = arith.addf %65, %71 : vector<4x256xf32>
    %73 = vector.broadcast %18 : f32 to vector<4x256xf32>
    %74 = arith.mulf %69, %73 : vector<4x256xf32>
    %75 = arith.addf %68, %74 : vector<4x256xf32>
    %76 = vector.extract_strided_slice %44 {offsets = [0, 18], sizes = [4, 256], strides = [1, 1]} : vector<4x384xf32> to vector<4x256xf32>
    %77 = arith.subf %76, %45 : vector<4x256xf32>
    %78 = arith.mulf %77, %77 : vector<4x256xf32>
    %79 = arith.addf %72, %78 : vector<4x256xf32>
    %80 = vector.broadcast %19 : f32 to vector<4x256xf32>
    %81 = arith.mulf %76, %80 : vector<4x256xf32>
    %82 = arith.addf %75, %81 : vector<4x256xf32>
    %83 = vector.extract_strided_slice %44 {offsets = [0, 32], sizes = [4, 256], strides = [1, 1]} : vector<4x384xf32> to vector<4x256xf32>
    %84 = arith.subf %83, %45 : vector<4x256xf32>
    %85 = arith.mulf %84, %84 : vector<4x256xf32>
    %86 = arith.addf %79, %85 : vector<4x256xf32>
    %87 = vector.broadcast %20 : f32 to vector<4x256xf32>
    %88 = arith.mulf %83, %87 : vector<4x256xf32>
    %89 = arith.addf %82, %88 : vector<4x256xf32>
    %90 = vector.extract_strided_slice %44 {offsets = [0, 33], sizes = [4, 256], strides = [1, 1]} : vector<4x384xf32> to vector<4x256xf32>
    %91 = arith.subf %90, %45 : vector<4x256xf32>
    %92 = arith.mulf %91, %91 : vector<4x256xf32>
    %93 = arith.addf %86, %92 : vector<4x256xf32>
    %94 = vector.broadcast %21 : f32 to vector<4x256xf32>
    %95 = arith.mulf %90, %94 : vector<4x256xf32>
    %96 = arith.addf %89, %95 : vector<4x256xf32>
    %97 = vector.extract_strided_slice %44 {offsets = [0, 34], sizes = [4, 256], strides = [1, 1]} : vector<4x384xf32> to vector<4x256xf32>
    %98 = arith.subf %97, %45 : vector<4x256xf32>
    %99 = arith.mulf %98, %98 : vector<4x256xf32>
    %100 = arith.addf %93, %99 : vector<4x256xf32>
    %101 = vector.broadcast %22 : f32 to vector<4x256xf32>
    %102 = arith.mulf %97, %101 : vector<4x256xf32>
    %103 = arith.addf %96, %102 : vector<4x256xf32>
    %cst_21 = arith.constant dense<0.000000e+00> : vector<256xf32>
    %104 = vector.multi_reduction <add>, %100, %cst_21 [0] : vector<4x256xf32> to vector<256xf32>
    %105 = vector.shape_cast %104 : vector<256xf32> to vector<1x256xf32>
    %106 = vector.broadcast %13 : f32 to vector<1x256xf32>
    %107 = arith.mulf %105, %106 : vector<1x256xf32>
    %108 = vector.broadcast %14 : f32 to vector<1x256xf32>
    %109 = arith.cmpf ogt, %107, %108 : vector<1x256xf32>
    %110 = vector.shape_cast %109 : vector<1x256xi1> to vector<1x256xi1>
    %111 = vector.broadcast %110 : vector<1x256xi1> to vector<4x256xi1>
    %112 = arith.select %111, %103, %45 : vector<4x256xi1>, vector<4x256xf32>
    %113 = vector.extract_strided_slice %112 {offsets = [0, 0], sizes = [1, 256], strides = [1, 1]} : vector<4x256xf32> to vector<1x256xf32>
    %114 = vector.broadcast %24 : vector<8x1xf32> to vector<8x256xf32>
    %115 = vector.broadcast %113 : vector<1x256xf32> to vector<8x256xf32>
    %116 = arith.mulf %114, %115 : vector<8x256xf32>
    %117 = vector.extract_strided_slice %112 {offsets = [1, 0], sizes = [1, 256], strides = [1, 1]} : vector<4x256xf32> to vector<1x256xf32>
    %118 = vector.broadcast %25 : vector<8x1xf32> to vector<8x256xf32>
    %119 = vector.broadcast %117 : vector<1x256xf32> to vector<8x256xf32>
    %120 = arith.mulf %118, %119 : vector<8x256xf32>
    %121 = arith.addf %116, %120 : vector<8x256xf32>
    %122 = vector.extract_strided_slice %112 {offsets = [2, 0], sizes = [1, 256], strides = [1, 1]} : vector<4x256xf32> to vector<1x256xf32>
    %123 = vector.broadcast %26 : vector<8x1xf32> to vector<8x256xf32>
    %124 = vector.broadcast %122 : vector<1x256xf32> to vector<8x256xf32>
    %125 = arith.mulf %123, %124 : vector<8x256xf32>
    %126 = arith.addf %121, %125 : vector<8x256xf32>
    %127 = vector.extract_strided_slice %112 {offsets = [3, 0], sizes = [1, 256], strides = [1, 1]} : vector<4x256xf32> to vector<1x256xf32>
    %128 = vector.broadcast %27 : vector<8x1xf32> to vector<8x256xf32>
    %129 = vector.broadcast %127 : vector<1x256xf32> to vector<8x256xf32>
    %130 = arith.mulf %128, %129 : vector<8x256xf32>
    %131 = arith.addf %126, %130 : vector<8x256xf32>
    %c0_22 = arith.constant 0 : index
    %c0_23 = arith.constant 0 : index
    %132 = arith.index_cast %40 : i32 to index
    %133 = vector.load %arg7[%c0_22, %c0_23, %132] : memref<1x8x256xf32, #tpu.memory_space<vmem>>, vector<1x8x256xf32>
    %134 = vector.shape_cast %133 : vector<1x8x256xf32> to vector<8x256xf32>
    %135 = vector.shape_cast %131 : vector<8x256xf32> to vector<1x8x256xf32>
    tpu.vector_store %arg7[%c0_22, %c0_23, %132], %135 {strides = array<i32>} : memref<1x8x256xf32, #tpu.memory_space<vmem>>, vector<1x8x256xf32>,
    %c1_i32_24 = arith.constant 1 : i32
    return
  }
  func.func @transform_0(%arg0: i32, %arg1: i32) -> i32 {
    %c0_i32 = arith.constant 0 : i32
    %c0_i32_0 = arith.constant 0 : i32
    return %c0_i32 : i32
  }
  func.func @transform_1(%arg0: i32, %arg1: i32) -> i32 {
    %c0_i32 = arith.constant 0 : i32
    %c0_i32_0 = arith.constant 0 : i32
    return %c0_i32 : i32
  }
  func.func @transform_2(%arg0: i32, %arg1: i32) -> i32 {
    %c0_i32 = arith.constant 0 : i32
    %c0_i32_0 = arith.constant 0 : i32
    return %c0_i32 : i32
  }
  func.func @transform_3(%arg0: i32, %arg1: i32) -> (i32, i32) {
    %c0_i32 = arith.constant 0 : i32
    %c0_i32_0 = arith.constant 0 : i32
    %c0_i32_1 = arith.constant 0 : i32
    return %c0_i32, %c0_i32_0 : i32, i32
  }
  func.func @transform_5(%arg0: i32, %arg1: i32) -> (i32, i32, i32) {
    %c0_i32 = arith.constant 0 : i32
    %c0_i32_0 = arith.constant 0 : i32
    return %arg0, %c0_i32, %arg1 : i32, i32, i32
  }
}

</mosaic_0001>

<bundles_post_ra>
// kernel: spconv2d.1
= control target key start
LH: loop header
LB: loop body
LE: loop exit
PB: predicated region body
PF: predicated region fallthrough
CT: control target
= control target key end

     0   :  { %s1309_s0 = inlined_call_operand.<no memory space> [shape: f32[1], index: 0, kind: input, shape index: {}]   ;;  %s1310_s1 = inlined_call_operand.<no memory space> [shape: f32[1], index: 1, kind: input, shape index: {}]   ;;  %s1311_s2 = inlined_call_operand.vmem [shape: f32[8], index: 2, kind: input, shape index: {}]   ;;  %s1312_s3 = inlined_call_operand.vmem [shape: f32[8,4], index: 3, kind: input, shape index: {}]   ;;  %s1313_s4 = inlined_call_operand.vmem [shape: f32[2,4,384], index: 4, kind: input, shape index: {}]   ;;  %s1314_s5 = inlined_call_operand.vmem [shape: f32[2,8,256], index: 5, kind: output, shape index: {}]  }
   0x1   :  { %10 = sst [smem:[#allocation4]] %s1309_s0 }
   0x2   :  { %11 = sst [smem:[#allocation5]] %s1310_s1 }
   0x3   :  { %12 = vsyncpa [#allocation7], 0  ;;  %s1052_s22 = smov 0   ;;  %s1054_s23 = smov 0  }
   0x4   :  { %s1056_s24 = smov 0  }
   0x5 LB: > { %s866_s0 = sadd.s32 4294967295, %s996_s24   ;;  %s30_s1 = sadd.s32 1, %s992_s23  ;;  %s996_s24 = sphi %s1056_s24, %s18_s24   ;;  %s992_s23 = sphi %s1054_s23, %s1316_s23   ;;  %s988_s22 = sphi %s1052_s22, %s1315_s22  }
   0x6   : > { %p32_p0 = scmp.ge.s32.totalorder %s30_s1, 2  ;;  %p868_p1 = scmp.ge.s32.totalorder %s996_s24, 1 }
   0x7   : > { %p147_p2 = scmp.lt.s32.totalorder %s996_s24, 3  ;;  %p904_p4 = scmp.eq.s32.totalorder %s866_s0, 0 }
   0x8   : > { %s1318_s1 = smov (%p32_p0, %s30_s1), 0  ;;  %s165_s27 = sshll.u32 %s1311_s2, 4  ;;  %s166_s27 = int_to_ptr.vmem [resolvable:$true] %s165_s27 }
   0x9   : > { %p148_p3 = pnand %p868_p1, %p147_p2  ;;  %s998_s28 = smov [#allocation6]  }
   0xb   : > { %p900_p5 = pneg %p148_p3  ;;  %181 = sbr.rel (%p148_p3) target bundleno = 494 (0x1ee), region = 36 }
   0xd   : > { %p901_p6 = pnand %p904_p4, %p900_p5 }
   0xf   : > { %903 = dma.vmem_to_smem (!%p901_p6), %s166_s27, 16, %s998_s28, [#allocation7]  }
  0x10   : > { %981 = dma.done.wait (%p904_p4), [#allocation7], 16  }
  0x11   : > { %983 = vsyncadd (%p904_p4), [#allocation7], 4294967280 }
  0x12   : > { %188 = sfence }
  0x13   : > { %p209_p7 = scmp.lt.s32.totalorder %s988_s22, 1  ;;  %s893_s29 = smul.u32 12, %s988_s22 }
  0x15   : > { %s1320_s22 = smov (!%p209_p7, %s988_s22), 1  ;;  %s236_s7 = scalar_lea.vmem %s1313_s4, %s893_s29 }
  0x16   : > { %s892_s8 = sshll.u32 %s1320_s22, 4  ;;  %v249_v0 = vld [vmem:[%s236_s7] sm:$0xff]  ;;  %v875_v1 = vld [vmem:[%s236_s7 + $0x8] sm:$0xf] }
  0x17   : > { %s1080_s11 = scalar_lea.vmem %s1314_s5, %s892_s8  ;;  %250 = vst [vmem:[#allocation2] sm:$0xff] %v249_v0 }
  0x18   : > { %262 = vst [vmem:[#allocation2 + $0x8] sm:$0xf] %v875_v1 }
  0x19   : > { %266 = vsyncadd [#allocation3], 192  ;;  %s1082_s12 = sld [smem:[#allocation4]]  ;;  %v1087_v2 = vld [vmem:[%s1312_s3] sm:$0xff] }
  0x1a   : > { %s1089_s15 = sld [smem:[#allocation5]] }
  0x1b   : > { %s1091_s16 = sld [smem:[#allocation6]] }
  0x1c   : > { %s1093_s17 = sld [smem:[#allocation6 + $0x1]] }
  0x1d   : > { %s1095_s18 = sld [smem:[#allocation6 + $0x2]] }
  0x1e   : > { %s1097_s19 = sld [smem:[#allocation6 + $0x3]] }
  0x1f   : > { %s1099_s20 = sld [smem:[#allocation6 + $0x4]] }
  0x20   : > { %s1101_s21 = sld [smem:[#allocation6 + $0x5]] }
  0x21   : > { %s1103_s22 = sld [smem:[#allocation6 + $0x6]] }
  0x22   : > { %s1105_s0 = sld [smem:[#allocation6 + $0x7]] }
  0x23   : > { %984 = dma.done.wait [#allocation3], 192 }
  0x24   : > { %985 = vsyncadd [#allocation3], 4294967104  ;;  %v1107_v3 = vld [vmem:[#allocation2] sm:$0xff]  ;;  %v1109_v4 = vld [vmem:[#allocation2 + $0x8] sm:$0xf]  ;;  %s999_s25 = smov 113   ;;  %v382_v5 = vstv %s1093_s17  ;;  %v425_v6 = vstv %s1095_s18  ;;  %v466_v11 = vstv %s1097_s19 }
  0x25   : > { %397 = vrot.lane.b32.xlu1 %v1107_v3, %s999_s25  ;;  %s1000_s26 = smov 112   ;;  %687 = vst [vmem:[#allocation1 + $0x10] ss:$2 sm:$0xff] %v1109_v4  ;;  %s1001_s27 = smov 127   ;;  %v384_v7 = vmul.f32 %v382_v5, %v1109_v4  ;;  %v383_v8 = vmul.f32 %v382_v5, %v1107_v3  ;;  %v427_v9 = vmul.f32 %v425_v6, %v1109_v4  ;;  %vm486_vm0 = vcmask 7168  }
  0x26   : > { %354 = vrot.lane.b32.xlu0 %v1107_v3, %s1000_s26  ;;  %440 = vrot.lane.b32.xlu2 %v1107_v3, %s1001_s27  ;;  %s1002_s28 = smov 1   ;;  %s1003_s29 = smov 15   ;;  %v426_v10 = vmul.f32 %v425_v6, %v1107_v3  ;;  %v468_v12 = vmul.f32 %v466_v11, %v1109_v4  ;;  %v467_v13 = vmul.f32 %v466_v11, %v1107_v3  ;;  %vm528_vm1 = vcmask 121856  }
  0x27   : > { %s1004_s30 = smov 16   ;;  %s1005_s6 = smov 17   ;;  %vm570_vm2 = vcmask 130048   ;;  %vm343_vm3 = vcmask 1043456   ;;  %vm612_vm4 = vcmask 138240   ;;  %vm404_vm5 = vcmask 924672  }
  0x28   : > { %s1006_s7 = smov 111   ;;  %s1007_s8 = smov 126   ;;  %vm378_vm6 = vcmask 1039360   ;;  %vm361_vm7 = vcmask 916480   ;;  %vm345_vm8 = vcmask 908288   ;;  %vm421_vm9 = vcmask 1031168  }
  0x29   : > { %s1008_s9 = smov 110   ;;  %s1009_s10 = smov 96   ;;  %vm504_vm10 = vcmask 900096   ;;  %vm546_vm11 = vcmask 785408   ;;  %vm588_vm12 = vcmask 777216   ;;  %vm630_vm13 = vcmask 769024  }
  0x2a   : > { %s1010_s13 = smov 95   ;;  %s1011_s14 = smov 94  }
  0x2d   : > { %399 = vrot.lane.b32.xlu1 %v1109_v4, %s999_s25 }
  0x2e   : > { %356 = vrot.lane.b32.xlu0 %v1109_v4, %s1000_s26  ;;  %442 = vrot.lane.b32.xlu2 %v1109_v4, %s1001_s27 }
  0x35   : > { %483 = vrot.lane.b32.xlu1 %v1109_v4, %s1002_s28 }
  0x36   : > { %481 = vrot.lane.b32.xlu0 %v1107_v3, %s1002_s28  ;;  %523 = vrot.lane.b32.xlu2 %v1107_v3, %s1003_s29 }
  0x3d   : > { %565 = vrot.lane.b32.xlu1 %v1107_v3, %s1004_s30 }
  0x3e   : > { %525 = vrot.lane.b32.xlu0 %v1109_v4, %s1003_s29  ;;  %567 = vrot.lane.b32.xlu2 %v1109_v4, %s1004_s30 }
  0x45   : > { %609 = vrot.lane.b32.xlu1 %v1109_v4, %s1005_s6 }
  0x46   : > { %607 = vrot.lane.b32.xlu0 %v1107_v3, %s1005_s6  ;;  %337 = vrot.lane.b32.xlu2 %v1107_v3, %s1006_s7 }
  0x4d   : > { %389 = vrot.lane.b32.xlu1 %v384_v7, %s1001_s27 }
  0x4e   : > { %339 = vrot.lane.b32.xlu0 %v1109_v4, %s1006_s7  ;;  %432 = vrot.lane.b32.xlu2 %v427_v9, %s1007_s8 }
  0x55   : > { %430 = vrot.lane.b32.xlu1 %v426_v10, %s1007_s8 }
  0x56   : > { %387 = vrot.lane.b32.xlu0 %v383_v8, %s1001_s27  ;;  %471 = vrot.lane.b32.xlu2 %v467_v13, %s1000_s26 }
  0x5e   : > { %473 = vrot.lane.b32.xlu0 %v468_v12, %s1000_s26 }
  0x80   : > { %v1149_v14 = vpop.permute.xlu2 %440 }
  0x81   : > { %v444_v52 = vrot.slane %v1149_v14, 4 }
  0x88   : > { %v1151_v15 = vpop.permute.xlu2 %442 }
  0x89   : > { %v451_v16 = vsub.f32 %v1109_v4, %v1151_v15  ;;  %v445_v53 = vrot.slane %v1151_v15, 4 }
  0x8b   : > { %v453_v17 = vmul.f32 %v451_v16, %v451_v16  ;;  %v446_v62 = vsel %vm343_vm3, %v444_v52, %v445_v53 }
  0x8c   : > { %v447_v11 = vsel %vm378_vm6, %v1149_v14, %v446_v62 }
  0x8d   : > { %458 = vrot.lane.b32.xlu0 %v453_v17, %s1000_s26  ;;  %v450_v15 = vsub.f32 %v1107_v3, %v447_v11 }
  0x8f   : > { %v452_v14 = vmul.f32 %v450_v15, %v450_v15 }
  0x90   : > { %v524_v26 = vpop.permute.xlu2 %523 }
  0x91   : > { %v527_v30 = vrot.slane %v524_v26, 4 }
  0x93   : > { %v529_v37 = vsel %vm528_vm1, %v527_v30, %v524_v26 }
  0x94   : > { %v533_v43 = vsub.f32 %v1107_v3, %v529_v37 }
  0x96   : > { %v535_v50 = vmul.f32 %v533_v43, %v533_v43 }
  0x97   : > { %v1156_v18 = vpop.permute.xlu1 %397 }
  0x98   : > { %v1158_v19 = vpop.permute.xlu0 %354  ;;  %v568_v38 = vpop.permute.xlu2 %567  ;;  %v401_v54 = vrot.slane %v1156_v18, 4 }
  0x99   : > { %v358_v60 = vrot.slane %v1158_v19, 4 }
  0x9f   : > { %v400_v20 = vpop.permute.xlu1 %399 }
  0xa0   : > { %v1160_v21 = vpop.permute.xlu0 %356  ;;  %v409_v22 = vsub.f32 %v1109_v4, %v400_v20  ;;  %v402_v49 = vrot.slane %v400_v20, 4  ;;  %v508_v20 = vstv %s1099_s20 }
  0xa1   : > { %v366_v23 = vsub.f32 %v1109_v4, %v1160_v21  ;;  %v359_v55 = vrot.slane %v1160_v21, 4  ;;  %v550_v21 = vstv %s1101_s21 }
  0xa2   : > { %v411_v24 = vmul.f32 %v409_v22, %v409_v22  ;;  %v403_v61 = vsel %vm343_vm3, %v401_v54, %v402_v49  ;;  %v510_v22 = vmul.f32 %v508_v20, %v1109_v4 }
  0xa3   : > { %v368_v25 = vmul.f32 %v366_v23, %v366_v23  ;;  %v360_v1 = vsel %vm343_vm3, %v358_v60, %v359_v55  ;;  %v405_v8 = vsel %vm404_vm5, %v1156_v18, %v403_v61  ;;  %v551_v23 = vmul.f32 %v550_v21, %v1107_v3 }
  0xa4   : > { %416 = vrot.lane.b32.xlu1 %v411_v24, %s1007_s8  ;;  %v362_v12 = vsel %vm361_vm7, %v1158_v19, %v360_v1  ;;  %v408_v13 = vsub.f32 %v1107_v3, %v405_v8  ;;  %v509_v19 = vmul.f32 %v508_v20, %v1107_v3  ;;  %v592_v24 = vstv %s1103_s22 }
  0xa5   : > { %373 = vrot.lane.b32.xlu2 %v368_v25, %s1001_s27  ;;  %v365_v16 = vsub.f32 %v1107_v3, %v362_v12  ;;  %v552_v25 = vmul.f32 %v550_v21, %v1109_v4  ;;  %v593_v26 = vmul.f32 %v592_v24, %v1107_v3 }
  0xa6   : > { %v410_v17 = vmul.f32 %v408_v13, %v408_v13 }
  0xa7   : > { %v484_v27 = vpop.permute.xlu1 %483  ;;  %v367_v18 = vmul.f32 %v365_v16, %v365_v16 }
  0xa8   : > { %v482_v28 = vpop.permute.xlu0 %481 }
  0xa9   : > { %v485_v29 = vrot.slane %v482_v28, 4 }
  0xab   : > { %v487_v31 = vsel %vm486_vm0, %v485_v29, %v482_v28  ;;  %v488_v32 = vsel %vm486_vm0, %v485_v29, %v484_v27  ;;  %v594_v27 = vmul.f32 %v592_v24, %v1109_v4  ;;  %v634_v28 = vstv %s1105_s0 }
  0xac   : > { %v491_v33 = vsub.f32 %v1107_v3, %v487_v31  ;;  %v492_v34 = vsub.f32 %v1109_v4, %v488_v32  ;;  %v635_v29 = vmul.f32 %v634_v28, %v1107_v3  ;;  %v338_v31 = vpop.permute.xlu2 %337 }
  0xae   : > { %v493_v35 = vmul.f32 %v491_v33, %v491_v33  ;;  %v494_v36 = vmul.f32 %v492_v34, %v492_v34 }
  0xaf   : > { %v566_v39 = vpop.permute.xlu1 %565 }
  0xb0   : > { %v526_v40 = vpop.permute.xlu0 %525  ;;  %499 = vrot.lane.b32.xlu2 %v494_v36, %s1008_s9  ;;  %497 = vrot.lane.b32.xlu1 %v493_v35, %s1008_s9  ;;  %v569_v41 = vrot.slane %v566_v39, 4 }
  0xb1   : > { %v530_v42 = vsel %vm528_vm1, %v527_v30, %v526_v40  ;;  %v636_v30 = vmul.f32 %v634_v28, %v1109_v4  ;;  %v690_v28 = vld.sshfl [vmem:[#allocation1 + $0x10] sm:$0xff pattern:$0x75316420] }
  0xb2   : > { %v534_v44 = vsub.f32 %v1109_v4, %v530_v42  ;;  %v572_v45 = vsel %vm570_vm2, %v569_v41, %v568_v38  ;;  %v571_v48 = vsel %vm570_vm2, %v569_v41, %v566_v39 }
  0xb3   : > { %v576_v47 = vsub.f32 %v1109_v4, %v572_v45  ;;  %v575_v56 = vsub.f32 %v1107_v3, %v571_v48 }
  0xb4   : > { %v536_v46 = vmul.f32 %v534_v44, %v534_v44  ;;  %v433_v32 = vpop.permute.xlu2 %432 }
  0xb5   : > { %v578_v51 = vmul.f32 %v576_v47, %v576_v47  ;;  %v577_v5 = vmul.f32 %v575_v56, %v575_v56  ;;  %v341_v47 = vrot.slane %v338_v31, 4 }
  0xb6   : > { %541 = vrot.lane.b32.xlu0 %v536_v46, %s1009_s10 }
  0xb7   : > { %v610_v58 = vpop.permute.xlu1 %609 }
  0xb8   : > { %v608_v57 = vpop.permute.xlu0 %607  ;;  %539 = vrot.lane.b32.xlu2 %v535_v50, %s1009_s10  ;;  %583 = vrot.lane.b32.xlu1 %v578_v51, %s1010_s13 }
  0xb9   : > { %v611_v59 = vrot.slane %v608_v57, 4 }
  0xbb   : > { %v613_v63 = vsel %vm612_vm4, %v611_v59, %v608_v57  ;;  %v614_v0 = vsel %vm612_vm4, %v611_v59, %v610_v58  ;;  %v351_v59 = vstv %s1091_s16 }
  0xbc   : > { %v617_v6 = vsub.f32 %v1107_v3, %v613_v63  ;;  %v618_v7 = vsub.f32 %v1109_v4, %v614_v0  ;;  %v1222_v34 = vpop.permute.xlu2 %471  ;;  %v352_v12 = vmul.f32 %v351_v59, %v1107_v3 }
  0xbe   : > { %v619_v9 = vmul.f32 %v617_v6, %v617_v6  ;;  %v620_v10 = vmul.f32 %v618_v7, %v618_v7  ;;  %581 = vrot.lane.b32.xlu0 %v577_v5, %s1010_s13  ;;  %v435_v5 = vrot.slane %v433_v32, 4 }
  0xbf   : > { %v390_v35 = vpop.permute.xlu1 %389 }
  0xc0   : > { %625 = vrot.lane.b32.xlu2 %v620_v10, %s1011_s14  ;;  %623 = vrot.lane.b32.xlu1 %v619_v9, %s1011_s14  ;;  %v340_v33 = vpop.permute.xlu0 %339  ;;  %v392_v53 = vrot.slane %v390_v35, 4 }
  0xc1   : > { %v342_v48 = vrot.slane %v340_v33, 4 }
  0xc3   : > { %v344_v50 = vsel %vm343_vm3, %v341_v47, %v342_v48 }
  0xc4   : > { %v346_v52 = vsel %vm345_vm8, %v338_v31, %v344_v50 }
  0xc5   : > { %v348_v57 = vsub.f32 %v1107_v3, %v346_v52 }
  0xc6   : > { %414 = vrot.lane.b32.xlu0 %v410_v17, %s1007_s8 }
  0xc7   : > { %v1224_v38 = vpop.permute.xlu1 %430  ;;  %v349_v7 = vmul.f32 %v348_v57, %v348_v57 }
  0xc8   : > { %456 = vrot.lane.b32.xlu2 %v452_v14, %s1000_s26  ;;  %371 = vrot.lane.b32.xlu1 %v367_v18, %s1001_s27  ;;  %v388_v36 = vpop.permute.xlu0 %387  ;;  %v434_v6 = vrot.slane %v1224_v38, 4 }
  0xc9   : > { %v391_v54 = vrot.slane %v388_v36, 4 }
  0xca   : > { %v436_v21 = vsel %vm343_vm3, %v434_v6, %v435_v5 }
  0xcb   : > { %v393_v60 = vsel %vm343_vm3, %v391_v54, %v392_v53 }
  0xcc   : > { %v394_v13 = vsel %vm378_vm6, %v388_v36, %v393_v60 }
  0xce   : > { %513 = vrot.lane.b32.xlu0 %v509_v19, %s1008_s9  ;;  %v475_v19 = vrot.slane %v1222_v34, 4 }
  0xd0   : > { %515 = vrot.lane.b32.xlu1 %v510_v22, %s1008_s9  ;;  %555 = vrot.lane.b32.xlu2 %v551_v23, %s1009_s10  ;;  %v1226_v40 = vpop.permute.xlu0 %473 }
  0xd6   : > { %557 = vrot.lane.b32.xlu0 %v552_v25, %s1009_s10 }
  0xd8   : > { %597 = vrot.lane.b32.xlu1 %v593_v26, %s1010_s13  ;;  %599 = vrot.lane.b32.xlu2 %v594_v27, %s1010_s13 }
  0xde   : > { %639 = vrot.lane.b32.xlu0 %v635_v29, %s1011_s14  ;;  %v396_v29 = vadd.f32 %v394_v13, %v352_v12  ;;  %v1014_v13 = vmov 0  }
  0xdf   : > { %948 = vset.pattern.permute.xlu2 %v1014_v13 }
  0xe0   : > { %641 = vrot.lane.b32.xlu1 %v636_v30, %s1011_s14  ;;  %v476_v30 = vrot.slane %v1226_v40, 4  ;;  %705 = vperm.xlu2 %948, %v1087_v2  }
  0xe2   : > { %v477_v50 = vsel %vm343_vm3, %v475_v19, %v476_v30 }
  0xe3   : > { %v478_v59 = vsel %vm361_vm7, %v1222_v34, %v477_v50 }
  0xe8   : > { %695 = vrot.lane.b32.xlu1 %v690_v28, %s1006_s7 }
  0xff   : > { %v374_v37 = vpop.permute.xlu2 %373  ;;  %v459_v42 = vpop.permute.xlu0 %458 }
 0x100   : > { %v376_v62 = vrot.slane %v374_v37, 4  ;;  %v461_v8 = vrot.slane %v459_v42, 4 }
 0x10a   : > { %v500_v39 = vpop.permute.xlu2 %499 }
 0x10b   : > { %v502_v17 = vrot.slane %v500_v39, 4  ;;  %v437_v39 = vsel %vm421_vm9, %v1224_v38, %v436_v21  ;;  %v1015_v21 = vmov 3  }
 0x10c   : > { %v439_v54 = vadd.f32 %v437_v39, %v396_v29  ;;  %951 = vset.pattern.permute.xlu2 %v1015_v21 }
 0x10e   : > { %v480_v6 = vadd.f32 %v478_v59, %v439_v54 }
 0x112   : > { %v1228_v4 = vpop.permute.xlu2 %539 }
 0x113   : > { %v543_v24 = vrot.slane %v1228_v4, 4 }
 0x116   : > { %v417_v41 = vpop.permute.xlu1 %416 }
 0x117   : > { %v419_v63 = vrot.slane %v417_v41, 4 }
 0x11a   : > { %v1232_v46 = vpop.permute.xlu2 %625 }
 0x122   : > { %v498_v43 = vpop.permute.xlu1 %497  ;;  %v457_v55 = vpop.permute.xlu2 %456 }
 0x123   : > { %v460_v0 = vrot.slane %v457_v55, 4  ;;  %v501_v9 = vrot.slane %v498_v43, 4 }
 0x125   : > { %v462_v14 = vsel %vm343_vm3, %v460_v0, %v461_v8  ;;  %v503_v25 = vsel %vm343_vm3, %v501_v9, %v502_v17 }
 0x126   : > { %v463_v31 = vsel %vm361_vm7, %v457_v55, %v462_v14  ;;  %v505_v41 = vsel %vm504_vm10, %v498_v43, %v503_v25 }
 0x128   : > { %v542_v44 = vpop.permute.xlu0 %541 }
 0x129   : > { %v544_v18 = vrot.slane %v542_v44, 4  ;;  %v628_v44 = vrot.slane %v1232_v46, 4 }
 0x12a   : > { %v1230_v45 = vpop.permute.xlu1 %583  ;;  %v556_v16 = vpop.permute.xlu2 %555 }
 0x12b   : > { %v545_v33 = vsel %vm343_vm3, %v543_v24, %v544_v18  ;;  %v586_v35 = vrot.slane %v1230_v45, 4  ;;  %v559_v38 = vrot.slane %v556_v16, 4 }
 0x12c   : > { %v547_v45 = vsel %vm546_vm11, %v1228_v4, %v545_v33 }
 0x130   : > { %v1234_v49 = vpop.permute.xlu0 %581 }
 0x131   : > { %v585_v26 = vrot.slane %v1234_v49, 4 }
 0x132   : > { %v1237_v51 = vpop.permute.xlu1 %623 }
 0x133   : > { %v627_v36 = vrot.slane %v1237_v51, 4  ;;  %v587_v47 = vsel %vm343_vm3, %v585_v26, %v586_v35 }
 0x134   : > { %v589_v43 = vsel %vm588_vm12, %v1234_v49, %v587_v47 }
 0x135   : > { %v629_v52 = vsel %vm343_vm3, %v627_v36, %v628_v44 }
 0x136   : > { %v631_v4 = vsel %vm630_vm13, %v1237_v51, %v629_v52 }
 0x138   : > { %v415_v56 = vpop.permute.xlu0 %414 }
 0x139   : > { %v418_v58 = vrot.slane %v415_v56, 4 }
 0x13a   : > { %v372_v61 = vpop.permute.xlu1 %371 }
 0x13b   : > { %v375_v1 = vrot.slane %v372_v61, 4  ;;  %v420_v10 = vsel %vm343_vm3, %v418_v58, %v419_v63 }
 0x13c   : > { %v422_v22 = vsel %vm421_vm9, %v415_v56, %v420_v10  ;;  %v600_v56 = vpop.permute.xlu2 %599 }
 0x13d   : > { %v377_v11 = vsel %vm343_vm3, %v375_v1, %v376_v62  ;;  %v1013_v62 = vmov 1   ;;  %v602_v0 = vrot.slane %v600_v56, 4 }
 0x13e   : > { %v379_v15 = vsel %vm378_vm6, %v372_v61, %v377_v11  ;;  %v1012_v61 = vmov 2   ;;  %949 = vset.pattern.permute.xlu0 %v1013_v62 }
 0x13f   : > { %v381_v20 = vadd.f32 %v379_v15, %v349_v7  ;;  %950 = vset.pattern.permute.xlu1 %v1012_v61 }
 0x140   : > { %v514_v23 = vpop.permute.xlu0 %513  ;;  %723 = vperm.xlu1 %950, %v1087_v2  }
 0x141   : > { %v424_v27 = vadd.f32 %v422_v22, %v381_v20  ;;  %v517_v42 = vrot.slane %v514_v23, 4 }
 0x142   : > { %v516_v32 = vpop.permute.xlu1 %515 }
 0x143   : > { %v465_v37 = vadd.f32 %v463_v31, %v424_v27  ;;  %v518_v40 = vrot.slane %v516_v32, 4 }
 0x144   : > { %v706_v39 = vpop.permute.xlu2 %705 }
 0x145   : > { %v507_v48 = vadd.f32 %v505_v41, %v465_v37  ;;  %v519_v46 = vsel %vm343_vm3, %v517_v42, %v518_v40  ;;  %v669_v42 = vstv %s1082_s12 }
 0x146   : > { %v520_v5 = vsel %vm504_vm10, %v514_v23, %v519_v46 }
 0x147   : > { %v549_v53 = vadd.f32 %v547_v45, %v507_v48  ;;  %v522_v7 = vadd.f32 %v520_v5, %v480_v6  ;;  %v672_v48 = vstv %s1089_s15 }
 0x148   : > { %v558_v55 = vpop.permute.xlu0 %557 }
 0x149   : > { %v591_v57 = vadd.f32 %v589_v43, %v549_v53  ;;  %v560_v58 = vrot.slane %v558_v55, 4 }
 0x14a   : > { %v598_v60 = vpop.permute.xlu1 %597 }
 0x14b   : > { %v633_v63 = vadd.f32 %v631_v4, %v591_v57  ;;  %v561_v49 = vsel %vm343_vm3, %v559_v38, %v560_v58  ;;  %v601_v1 = vrot.slane %v598_v60, 4 }
 0x14c   : > { %v562_v34 = vsel %vm546_vm11, %v556_v16, %v561_v49 }
 0x14d   : > { %650 = vst [vmem:[#allocation1] ss:$2 sm:$0xff] %v633_v63  ;;  %v603_v51 = vsel %vm343_vm3, %v601_v1, %v602_v0  ;;  %v564_v9 = vadd.f32 %v562_v34, %v522_v7 }
 0x14e   : > { %v604_v11 = vsel %vm588_vm12, %v598_v60, %v603_v51 }
 0x14f   : > { %v606_v17 = vadd.f32 %v604_v11, %v564_v9 }
 0x150   : > { %v640_v8 = vpop.permute.xlu0 %639 }
 0x151   : > { %v643_v10 = vrot.slane %v640_v8, 4 }
 0x152   : > { %v642_v12 = vpop.permute.xlu1 %641 }
 0x153   : > { %v644_v15 = vrot.slane %v642_v12, 4 }
 0x154   : > { %v651_v20 = vld.sshfl [vmem:[#allocation1] sm:$0xff pattern:$0x75316420]  ;;  %v652_v19 = vld.sshfl [vmem:[#allocation1 + $0x8] sm:$0xff pattern:$0x75316420] }
 0x155   : > { %v645_v14 = vsel %vm343_vm3, %v643_v10, %v644_v15  ;;  %v655_v26 = vsel %vm343_vm3, %v651_v20, 0.0  ;;  %v662_v27 = vsel %vm343_vm3, %v652_v19, 0.0 }
 0x156   : > { %v646_v18 = vsel %vm630_vm13, %v640_v8, %v645_v14  ;;  %v656_v28 = vrot.slane %v655_v26, 4  ;;  %v663_v29 = vrot.slane %v662_v27, 4 }
 0x157   : > { %v648_v16 = vadd.f32 %v646_v18, %v606_v17 }
 0x158   : > { %v664_v30 = vadd.f32 %v663_v29, %v662_v27 }
 0x159   : > { %680 = vst [vmem:[#allocation1] ss:$2 sm:$0xff] %v648_v16 }
 0x15a   : > { %v665_v32 = vrot.slane %v664_v30, 2  ;;  %v696_v47 = vpop.permute.xlu1 %695 }
 0x15c   : > { %v666_v35 = vadd.f32 %v665_v32, %v664_v30 }
 0x15e   : > { %v667_v37 = vrot.slane %v666_v35, 1 }
 0x160   : > { %v681_v22 = vld.sshfl [vmem:[#allocation1] sm:$0xff pattern:$0x75316420]  ;;  %v682_v23 = vld.sshfl [vmem:[#allocation1 + $0x8] sm:$0xff pattern:$0x75316420] }
 0x161   : > { %685 = vst [vmem:[#allocation1] ss:$2 sm:$0xff] %v1107_v3  ;;  %v657_v3 = vadd.f32 %v656_v28, %v655_v26 }
 0x163   : > { %v658_v31 = vrot.slane %v657_v3, 2 }
 0x165   : > { %v659_v33 = vadd.f32 %v658_v31, %v657_v3 }
 0x167   : > { %v660_v36 = vrot.slane %v659_v33, 1 }
 0x168   : > { %v689_v24 = vld.sshfl [vmem:[#allocation1 + $0x8] sm:$0xff pattern:$0x75316420]  ;;  %v688_v25 = vld.sshfl [vmem:[#allocation1] sm:$0xff pattern:$0x75316420] }
 0x169   : > { %693 = vrot.lane.b32.xlu0 %v689_v24, %s1006_s7  ;;  %691 = vrot.lane.b32.xlu2 %v688_v25, %s1006_s7  ;;  %v661_v41 = vadd.f32 %v660_v36, %v659_v33 }
 0x16b   : > { %v670_v40 = vmul.f32 %v669_v42, %v661_v41 }
 0x16d   : > { %vm673_vm14 = vcmp.gt.f32.partialorder %v670_v40, %v672_v48 }
 0x171   : > { %713 = vperm.xlu0 %949, %v1087_v2   ;;  %733 = vperm.xlu2 %951, %v1087_v2   ;;  %v668_v2 = vadd.f32 %v667_v37, %v666_v35 }
 0x173   : > { %v671_v44 = vmul.f32 %v669_v42, %v668_v2 }
 0x175   : > { %vm674_vm15 = vcmp.gt.f32.partialorder %v671_v44, %v672_v48 }
 0x179   : > { %952 = vset.pattern.permute.xlu0 %v1015_v21 }
 0x1b2   : > { %v724_v59 = vpop.permute.xlu1 %723 }
 0x1c3   : > { %v692_v50 = vpop.permute.xlu2 %691 }
 0x1cb   : > { %v734_v1 = vpop.permute.xlu2 %733 }
 0x1db   : > { %v694_v45 = vpop.permute.xlu0 %693 }
 0x1dc   : > { %v697_v52 = vsel %vm345_vm8, %v692_v50, %v694_v45  ;;  %v698_v53 = vsel %vm345_vm8, %v694_v45, %v696_v47 }
 0x1dd   : > { %v701_v38 = vsel %vm673_vm14, %v681_v22, %v697_v52  ;;  %v702_v54 = vsel %vm674_vm15, %v682_v23, %v698_v53 }
 0x1de   : > { %v709_v43 = vperm.slane %v702_v54, 0  ;;  %v708_v46 = vperm.slane %v701_v38, 0  ;;  %v726_v55 = vperm.slane %v701_v38, 2  ;;  %v727_v56 = vperm.slane %v702_v54, 2 }
 0x1df   : > { %v717_v57 = vperm.slane %v702_v54, 1  ;;  %v716_v58 = vperm.slane %v701_v38, 1  ;;  %v736_v4 = vperm.slane %v701_v38, 3  ;;  %v737_v60 = vperm.slane %v702_v54, 3 }
 0x1e0   : > { %v711_v62 = vmul.f32 %v709_v43, %v706_v39  ;;  %v710_v63 = vmul.f32 %v708_v46, %v706_v39  ;;  %v728_v5 = vmul.f32 %v726_v55, %v724_v59  ;;  %v729_v6 = vmul.f32 %v727_v56, %v724_v59 }
 0x1e1   : > { %v738_v51 = vmul.f32 %v736_v4, %v734_v1  ;;  %v739_v8 = vmul.f32 %v737_v60, %v734_v1 }
 0x1e3   : > { %v714_v61 = vpop.permute.xlu0 %713 }
 0x1e4   : > { %v718_v49 = vmul.f32 %v716_v58, %v714_v61  ;;  %v719_v0 = vmul.f32 %v717_v57, %v714_v61 }
 0x1e6   : > { %v720_v34 = vadd.f32 %v718_v49, %v710_v63  ;;  %v721_v7 = vadd.f32 %v719_v0, %v711_v62 }
 0x1e8   : > { %v730_v9 = vadd.f32 %v728_v5, %v720_v34  ;;  %v731_v10 = vadd.f32 %v729_v6, %v721_v7 }
 0x1ea   : > { %v740_v11 = vadd.f32 %v738_v51, %v730_v9  ;;  %v741_v12 = vadd.f32 %v739_v8, %v731_v10 }
 0x1ec   : > { %742 = vst [vmem:[%s1080_s11] sm:$0xff] %v740_v11 }
 0x1ed   : > { %743 = vst [vmem:[%s1080_s11 + $0x8] sm:$0xff] %v741_v12 }
 0x1ee PF: > { %s18_s24 = sadd.s32 1, %s996_s24   ;;  %s1315_s22 = smov %s992_s23 }
 0x1ef   : > { %p15_p8 = scmp.ge.s32.totalorder %s18_s24, 4   ;;  %s1316_s23 = smov %s1318_s1 }
 0x1f1   :  { %17 = sbr.rel (!%p15_p8) target bundleno = 5 (0x5), region = 148 }
 0x1f6   :  { %774 = vsyncpa [#allocation7], 1 }
 0x1f7   :  { %776 = vsyncpa [#allocation7 + $0x1], 1 }
 0x1f8   :  { %777 = vsyncmov [#allocation3] }
 0x1fb   :  { %s778_s12 = vpop.sfrf %777 }
 0x1fc   :  { %p890_p9 = scmp.ne.s32.totalorder %s778_s12, 0 }
 0x1fe   :  { %782 = shalt.err (%p890_p9)  }
 0x1ff   :  { %784 = vsyncmov [#allocation3 + $0x1] }
 0x202   :  { %s785_s11 = vpop.sfrf %784 }
 0x203   :  { %p891_p10 = scmp.ne.s32.totalorder %s785_s11, 0 }
 0x205   :  { %789 = shalt.err (%p891_p10)  }

</bundles_post_ra>
